<compile_context>
chip_gen: v7x
topology: tpu7x:2x2x1
jax: 0.10.0
libtpu: 0.0.40
codegen_flags: <defaults>
</compile_context>

<pallas_src>
import functools

import jax
import jax.numpy as jnp
from jax.experimental import pallas as pl
from jax.experimental.pallas import tpu as pltpu


# ---------------------------------------------------------------------------
# Fused Pallas kernel (one grid step = one batch element, full BasicBlock)
# ---------------------------------------------------------------------------

def _basic_block_kernel(x_ref, w1_ref, b1_ref, w2_ref, b2_ref,
                        out_ref, pad_ref, *, H, W, C):
    """x_ref   : (1, H, W*C)        packed input rows (channel fastest on lanes)
       wN_ref  : (3, (W+2)*C, W*C)  Toeplitz 3x3 conv weights, BN scale folded,
                                    K-rows permuted: interior cols first, halo last
       bN_ref  : (1, W*C)           folded BN bias tiled to the packed layout
       out_ref : (1, H, W*C)
       pad_ref : VMEM scratch (H+2, (W+2)*C) zero-padded activation buffer;
                 lanes [0, W*C) = interior, lanes [W*C, (W+2)*C) = zero halo.
    """
    WC = W * C

    # Zero the padded scratch (border must be zero; interior overwritten below).
    pad_ref[...] = jnp.zeros_like(pad_ref)

    x = x_ref[0]                                     # (H, W*C), f32
    pad_ref[1:H + 1, 0:WC] = x                       # lane-aligned interior write

    def conv3x3(w_ref):
        # One MXU matmul per vertical tap; the horizontal taps + channel
        # contraction are realised by the banded weight (K = (W+2)*C).
        acc = jnp.zeros((H, WC), jnp.float32)
        for kh in range(3):
            acc = acc + jnp.dot(pad_ref[kh:kh + H, :], w_ref[kh],
                                preferred_element_type=jnp.float32)
        return acc

    # conv1 (+ folded bn1) + relu -- intermediate stays in VMEM / vregs.
    y1 = jnp.maximum(conv3x3(w1_ref) + b1_ref[...], 0.0)

    # Reuse the same scratch for conv2's padded input (halo is still zero).
    pad_ref[1:H + 1, 0:WC] = y1

    # conv2 (+ folded bn2) + residual add + relu.
    y2 = jnp.maximum(conv3x3(w2_ref) + b2_ref[...] + x, 0.0)
    out_ref[0] = y2.astype(out_ref.dtype)


# ---------------------------------------------------------------------------
# Wrapper: layout packing, BN folding, Toeplitz weight expansion, pallas_call
# ---------------------------------------------------------------------------

def _toeplitz_weights(w_oihw, W, scale):
    """Expand a (cout, cin, 3, 3) OIHW conv weight into 3 banded matrices
    Wt[kh] of shape ((W+2)*cin, W*cout) so a row-slab matmul realises the
    horizontal (kw) taps and the channel contraction in one MXU dot.
    The per-output-channel BN scale is folded in, and the K rows are permuted
    so interior padded-columns come first and the two zero-halo column blocks
    last (matching the kernel's padded-buffer lane layout)."""
    cout, cin, KH, KW = w_oihw.shape
    A = jnp.transpose(w_oihw, (2, 3, 1, 0))            # (KH, KW, cin, cout)
    wj = jnp.arange(W + 2)[:, None]                    # padded column index
    wo = jnp.arange(W)[None, :]                        # output column index
    kw = wj - wo                                       # (W+2, W)
    valid = ((kw >= 0) & (kw < KW)).astype(w_oihw.dtype)
    kw_c = jnp.clip(kw, 0, KW - 1)
    # T[kh, wj, w, ci, co] = A[kh, wj-w, ci, co] if 0 <= wj-w < KW else 0
    T = A[:, kw_c] * valid[None, :, :, None, None]     # (KH, W+2, W, cin, cout)
    T = T * scale[None, None, None, None, :]           # fold BN scale into weight
    T = jnp.transpose(T, (0, 1, 3, 2, 4))              # (KH, W+2, cin, W, cout)
    # padded-column order: [1..W] (interior) then [0, W+1] (zero halo blocks)
    order = jnp.concatenate([jnp.arange(1, W + 1), jnp.array([0, W + 1])])
    T = T[:, order]
    return T.reshape(KH, (W + 2) * cin, W * cout)


def _fold_bn(gamma, beta, mean, var, eps=1e-5):
    """Inference-mode BN folded to per-channel (scale, bias)."""
    scale = gamma / jnp.sqrt(var + eps)
    bias = beta - mean * scale
    return scale, bias


def basic_block_forward(x_nchw, params):
    """Pallas implementation of BasicBlock.forward (stride=1, downsample=None)."""
    B, C, H, W = x_nchw.shape
    WC, WPC = W * C, (W + 2) * C

    # NCHW -> packed rows (B, H, W*C): channel varies fastest along lanes.
    x_rows = jnp.transpose(x_nchw, (0, 2, 3, 1)).reshape(B, H, WC)

    s1, b1 = _fold_bn(params["bn1_gamma"], params["bn1_beta"],
                      params["bn1_mean"], params["bn1_var"])
    s2, b2 = _fold_bn(params["bn2_gamma"], params["bn2_beta"],
                      params["bn2_mean"], params["bn2_var"])
    w1t = _toeplitz_weights(params["conv1_w"], W, s1)   # (3, (W+2)*C, W*C)
    w2t = _toeplitz_weights(params["conv2_w"], W, s2)
    b1p = jnp.tile(b1, W).reshape(1, WC)                # packed (1, W*C) bias
    b2p = jnp.tile(b2, W).reshape(1, WC)

    kernel = functools.partial(_basic_block_kernel, H=H, W=W, C=C)

    out_rows = pl.pallas_call(
        kernel,
        out_shape=jax.ShapeDtypeStruct((B, H, WC), jnp.float32),
        grid=(B,),
        in_specs=[
            pl.BlockSpec((1, H, WC), lambda b: (b, 0, 0)),     # x (per batch)
            pl.BlockSpec((3, WPC, WC), lambda b: (0, 0, 0)),   # conv1+bn1 weight
            pl.BlockSpec((1, WC), lambda b: (0, 0)),           # bn1 bias
            pl.BlockSpec((3, WPC, WC), lambda b: (0, 0, 0)),   # conv2+bn2 weight
            pl.BlockSpec((1, WC), lambda b: (0, 0)),           # bn2 bias
        ],
        out_specs=pl.BlockSpec((1, H, WC), lambda b: (b, 0, 0)),
        scratch_shapes=[pltpu.VMEM((H + 2, WPC), jnp.float32)],
        compiler_params=pltpu.CompilerParams(
            dimension_semantics=("parallel",)),
    )(x_rows, w1t, b1p, w2t, b2p)

    # packed rows -> NCHW
    return jnp.transpose(out_rows.reshape(B, H, W, C), (0, 3, 1, 2))


# ---------------------------------------------------------------------------
# Pure-JAX reference (correctness check only)
# ---------------------------------------------------------------------------

def _reference_forward(x_nchw, params, eps=1e-5):
    def conv(x, w):
        return jax.lax.conv_general_dilated(
            x, w, window_strides=(1, 1), padding=((1, 1), (1, 1)),
            dimension_numbers=("NCHW", "OIHW", "NCHW"))

    def bn(x, g, b, m, v):
        g, b, m, v = (t.reshape(1, -1, 1, 1) for t in (g, b, m, v))
        return (x - m) / jnp.sqrt(v + eps) * g + b

    out = conv(x_nchw, params["conv1_w"])
    out = bn(out, params["bn1_gamma"], params["bn1_beta"],
             params["bn1_mean"], params["bn1_var"])
    out = jnp.maximum(out, 0.0)
    out = conv(out, params["conv2_w"])
    out = bn(out, params["bn2_gamma"], params["bn2_beta"],
             params["bn2_mean"], params["bn2_var"])
    out = out + x_nchw
    return jnp.maximum(out, 0.0)


# ---------------------------------------------------------------------------
# Main
# ---------------------------------------------------------------------------

if __name__ == "__main__":
    B, C, Hs, Ws = 2, 4, 16, 16   # inplanes = planes = 4, stride = 1
    key = jax.random.PRNGKey(0)
    ks = jax.random.split(key, 8)

    x = jax.random.normal(ks[0], (B, C, Hs, Ws), jnp.float32)

    params = {
        "conv1_w": jax.random.normal(ks[1], (C, C, 3, 3), jnp.float32) * 0.1,
        "conv2_w": jax.random.normal(ks[2], (C, C, 3, 3), jnp.float32) * 0.1,
        "bn1_gamma": 1.0 + 0.1 * jax.random.normal(ks[3], (C,), jnp.float32),
        "bn1_beta": 0.1 * jax.random.normal(ks[4], (C,), jnp.float32),
        "bn1_mean": 0.05 * jax.random.normal(ks[5], (C,), jnp.float32),
        "bn1_var": jnp.abs(1.0 + 0.1 * jax.random.normal(ks[6], (C,), jnp.float32)),
        "bn2_gamma": 1.0 + 0.1 * jax.random.normal(ks[7], (C,), jnp.float32),
        "bn2_beta": jnp.linspace(-0.1, 0.1, C, dtype=jnp.float32),
        "bn2_mean": jnp.linspace(-0.05, 0.05, C, dtype=jnp.float32),
        "bn2_var": jnp.linspace(0.9, 1.1, C, dtype=jnp.float32),
    }

    out = jax.jit(basic_block_forward)(x, params)
    out = jax.block_until_ready(out)

    ref = _reference_forward(x, params)
    assert out.shape == (B, C, Hs, Ws), out.shape
    assert jnp.allclose(out, ref, atol=1e-4, rtol=1e-4), \
        float(jnp.max(jnp.abs(out - ref)))

    print("KERNEL_OK")
</pallas_src>

<mosaic_0001>
module attributes {stable_mosaic.version = 11 : i64} {
  func.func @_basic_block_kernel(%arg0: i32, %arg1: memref<1x16x64xf32, #tpu.memory_space<vmem>>, %arg2: memref<3x72x64xf32, #tpu.memory_space<vmem>>, %arg3: memref<1x64xf32, #tpu.memory_space<vmem>>, %arg4: memref<3x72x64xf32, #tpu.memory_space<vmem>>, %arg5: memref<1x64xf32, #tpu.memory_space<vmem>>, %arg6: memref<1x16x64xf32, #tpu.memory_space<vmem>>, %arg7: memref<18x72xf32, #tpu.memory_space<vmem>>) attributes {dimension_semantics = [#tpu.dimension_semantics<parallel>], iteration_bounds = array<i64: 2>, scalar_prefetch = 0 : i64, scratch_operands = 1 : i64, tpu.core_type = #tpu.core_type<tc>, window_params = [{transform_indices = @transform_0, window_bounds = array<i64: 1, 16, 64>}, {pipeline_mode = #tpu.pipeline_mode<synchronous>, transform_indices = @transform_1, window_bounds = array<i64: 3, 72, 64>}, {pipeline_mode = #tpu.pipeline_mode<synchronous>, transform_indices = @transform_2, window_bounds = array<i64: 1, 64>}, {pipeline_mode = #tpu.pipeline_mode<synchronous>, transform_indices = @transform_3, window_bounds = array<i64: 3, 72, 64>}, {pipeline_mode = #tpu.pipeline_mode<synchronous>, transform_indices = @transform_4, window_bounds = array<i64: 1, 64>}, {transform_indices = @transform_5, window_bounds = array<i64: 1, 16, 64>}]} {
    %cst = arith.constant 0.000000e+00 : f32
    %0 = vector.broadcast %cst : f32 to vector<18x72xf32>
    %c0 = arith.constant 0 : index
    %c0_0 = arith.constant 0 : index
    %1 = vector.load %arg7[%c0, %c0_0] : memref<18x72xf32, #tpu.memory_space<vmem>>, vector<18x72xf32>
    tpu.vector_store %arg7[%c0, %c0_0], %0 {strides = array<i32>} : memref<18x72xf32, #tpu.memory_space<vmem>>, vector<18x72xf32>,
    %c0_1 = arith.constant 0 : index
    %c0_2 = arith.constant 0 : index
    %c0_3 = arith.constant 0 : index
    %2 = vector.load %arg1[%c0_1, %c0_2, %c0_3] : memref<1x16x64xf32, #tpu.memory_space<vmem>>, vector<1x16x64xf32>
    %3 = vector.shape_cast %2 : vector<1x16x64xf32> to vector<16x64xf32>
    %c1 = arith.constant 1 : index
    %c0_4 = arith.constant 0 : index
    %4 = vector.load %arg7[%c1, %c0_4] : memref<18x72xf32, #tpu.memory_space<vmem>>, vector<16x64xf32>
    tpu.vector_store %arg7[%c1, %c0_4], %3 {strides = array<i32>} : memref<18x72xf32, #tpu.memory_space<vmem>>, vector<16x64xf32>,
    %cst_5 = arith.constant 0.000000e+00 : f32
    %5 = vector.broadcast %cst_5 : f32 to vector<16x64xf32>
    %c0_6 = arith.constant 0 : index
    %c0_7 = arith.constant 0 : index
    %6 = vector.load %arg7[%c0_6, %c0_7] : memref<18x72xf32, #tpu.memory_space<vmem>>, vector<16x72xf32>
    %c0_8 = arith.constant 0 : index
    %c0_9 = arith.constant 0 : index
    %c0_10 = arith.constant 0 : index
    %7 = vector.load %arg2[%c0_8, %c0_9, %c0_10] : memref<3x72x64xf32, #tpu.memory_space<vmem>>, vector<1x72x64xf32>
    %8 = vector.shape_cast %7 : vector<1x72x64xf32> to vector<72x64xf32>
    %cst_11 = arith.constant dense<0.000000e+00> : vector<16x64xf32>
    %9 = tpu.matmul %6, %8, %cst_11 {dimension_numbers = #tpu.dot_dimension_numbers<[1], [0], [0], [1], [0, 0, 1, 1], [], []>} : vector<16x72xf32>, vector<72x64xf32>, vector<16x64xf32> -> vector<16x64xf32>
    %10 = arith.addf %5, %9 : vector<16x64xf32>
    %c1_12 = arith.constant 1 : index
    %c0_13 = arith.constant 0 : index
    %11 = vector.load %arg7[%c1_12, %c0_13] : memref<18x72xf32, #tpu.memory_space<vmem>>, vector<16x72xf32>
    %c1_14 = arith.constant 1 : index
    %c0_15 = arith.constant 0 : index
    %c0_16 = arith.constant 0 : index
    %12 = vector.load %arg2[%c1_14, %c0_15, %c0_16] : memref<3x72x64xf32, #tpu.memory_space<vmem>>, vector<1x72x64xf32>
    %13 = vector.shape_cast %12 : vector<1x72x64xf32> to vector<72x64xf32>
    %cst_17 = arith.constant dense<0.000000e+00> : vector<16x64xf32>
    %14 = tpu.matmul %11, %13, %cst_17 {dimension_numbers = #tpu.dot_dimension_numbers<[1], [0], [0], [1], [0, 0, 1, 1], [], []>} : vector<16x72xf32>, vector<72x64xf32>, vector<16x64xf32> -> vector<16x64xf32>
    %15 = arith.addf %10, %14 : vector<16x64xf32>
    %c2 = arith.constant 2 : index
    %c0_18 = arith.constant 0 : index
    %16 = vector.load %arg7[%c2, %c0_18] : memref<18x72xf32, #tpu.memory_space<vmem>>, vector<16x72xf32>
    %c2_19 = arith.constant 2 : index
    %c0_20 = arith.constant 0 : index
    %c0_21 = arith.constant 0 : index
    %17 = vector.load %arg2[%c2_19, %c0_20, %c0_21] : memref<3x72x64xf32, #tpu.memory_space<vmem>>, vector<1x72x64xf32>
    %18 = vector.shape_cast %17 : vector<1x72x64xf32> to vector<72x64xf32>
    %cst_22 = arith.constant dense<0.000000e+00> : vector<16x64xf32>
    %19 = tpu.matmul %16, %18, %cst_22 {dimension_numbers = #tpu.dot_dimension_numbers<[1], [0], [0], [1], [0, 0, 1, 1], [], []>} : vector<16x72xf32>, vector<72x64xf32>, vector<16x64xf32> -> vector<16x64xf32>
    %20 = arith.addf %15, %19 : vector<16x64xf32>
    %c0_23 = arith.constant 0 : index
    %c0_24 = arith.constant 0 : index
    %21 = vector.load %arg3[%c0_23, %c0_24] : memref<1x64xf32, #tpu.memory_space<vmem>>, vector<1x64xf32>
    %22 = vector.broadcast %21 : vector<1x64xf32> to vector<16x64xf32>
    %23 = arith.addf %20, %22 : vector<16x64xf32>
    %cst_25 = arith.constant 0.000000e+00 : f32
    %24 = vector.broadcast %cst_25 : f32 to vector<16x64xf32>
    %25 = arith.maximumf %23, %24 : vector<16x64xf32>
    %c1_26 = arith.constant 1 : index
    %c0_27 = arith.constant 0 : index
    %26 = vector.load %arg7[%c1_26, %c0_27] : memref<18x72xf32, #tpu.memory_space<vmem>>, vector<16x64xf32>
    tpu.vector_store %arg7[%c1_26, %c0_27], %25 {strides = array<i32>} : memref<18x72xf32, #tpu.memory_space<vmem>>, vector<16x64xf32>,
    %cst_28 = arith.constant 0.000000e+00 : f32
    %27 = vector.broadcast %cst_28 : f32 to vector<16x64xf32>
    %c0_29 = arith.constant 0 : index
    %c0_30 = arith.constant 0 : index
    %28 = vector.load %arg7[%c0_29, %c0_30] : memref<18x72xf32, #tpu.memory_space<vmem>>, vector<16x72xf32>
    %c0_31 = arith.constant 0 : index
    %c0_32 = arith.constant 0 : index
    %c0_33 = arith.constant 0 : index
    %29 = vector.load %arg4[%c0_31, %c0_32, %c0_33] : memref<3x72x64xf32, #tpu.memory_space<vmem>>, vector<1x72x64xf32>
    %30 = vector.shape_cast %29 : vector<1x72x64xf32> to vector<72x64xf32>
    %cst_34 = arith.constant dense<0.000000e+00> : vector<16x64xf32>
    %31 = tpu.matmul %28, %30, %cst_34 {dimension_numbers = #tpu.dot_dimension_numbers<[1], [0], [0], [1], [0, 0, 1, 1], [], []>} : vector<16x72xf32>, vector<72x64xf32>, vector<16x64xf32> -> vector<16x64xf32>
    %32 = arith.addf %27, %31 : vector<16x64xf32>
    %c1_35 = arith.constant 1 : index
    %c0_36 = arith.constant 0 : index
    %33 = vector.load %arg7[%c1_35, %c0_36] : memref<18x72xf32, #tpu.memory_space<vmem>>, vector<16x72xf32>
    %c1_37 = arith.constant 1 : index
    %c0_38 = arith.constant 0 : index
    %c0_39 = arith.constant 0 : index
    %34 = vector.load %arg4[%c1_37, %c0_38, %c0_39] : memref<3x72x64xf32, #tpu.memory_space<vmem>>, vector<1x72x64xf32>
    %35 = vector.shape_cast %34 : vector<1x72x64xf32> to vector<72x64xf32>
    %cst_40 = arith.constant dense<0.000000e+00> : vector<16x64xf32>
    %36 = tpu.matmul %33, %35, %cst_40 {dimension_numbers = #tpu.dot_dimension_numbers<[1], [0], [0], [1], [0, 0, 1, 1], [], []>} : vector<16x72xf32>, vector<72x64xf32>, vector<16x64xf32> -> vector<16x64xf32>
    %37 = arith.addf %32, %36 : vector<16x64xf32>
    %c2_41 = arith.constant 2 : index
    %c0_42 = arith.constant 0 : index
    %38 = vector.load %arg7[%c2_41, %c0_42] : memref<18x72xf32, #tpu.memory_space<vmem>>, vector<16x72xf32>
    %c2_43 = arith.constant 2 : index
    %c0_44 = arith.constant 0 : index
    %c0_45 = arith.constant 0 : index
    %39 = vector.load %arg4[%c2_43, %c0_44, %c0_45] : memref<3x72x64xf32, #tpu.memory_space<vmem>>, vector<1x72x64xf32>
    %40 = vector.shape_cast %39 : vector<1x72x64xf32> to vector<72x64xf32>
    %cst_46 = arith.constant dense<0.000000e+00> : vector<16x64xf32>
    %41 = tpu.matmul %38, %40, %cst_46 {dimension_numbers = #tpu.dot_dimension_numbers<[1], [0], [0], [1], [0, 0, 1, 1], [], []>} : vector<16x72xf32>, vector<72x64xf32>, vector<16x64xf32> -> vector<16x64xf32>
    %42 = arith.addf %37, %41 : vector<16x64xf32>
    %c0_47 = arith.constant 0 : index
    %c0_48 = arith.constant 0 : index
    %43 = vector.load %arg5[%c0_47, %c0_48] : memref<1x64xf32, #tpu.memory_space<vmem>>, vector<1x64xf32>
    %44 = vector.broadcast %43 : vector<1x64xf32> to vector<16x64xf32>
    %45 = arith.addf %42, %44 : vector<16x64xf32>
    %46 = arith.addf %45, %3 : vector<16x64xf32>
    %cst_49 = arith.constant 0.000000e+00 : f32
    %47 = vector.broadcast %cst_49 : f32 to vector<16x64xf32>
    %48 = arith.maximumf %46, %47 : vector<16x64xf32>
    %c0_50 = arith.constant 0 : index
    %c0_51 = arith.constant 0 : index
    %c0_52 = arith.constant 0 : index
    %49 = vector.load %arg6[%c0_50, %c0_51, %c0_52] : memref<1x16x64xf32, #tpu.memory_space<vmem>>, vector<1x16x64xf32>
    %50 = vector.shape_cast %49 : vector<1x16x64xf32> to vector<16x64xf32>
    %51 = vector.shape_cast %48 : vector<16x64xf32> to vector<1x16x64xf32>
    tpu.vector_store %arg6[%c0_50, %c0_51, %c0_52], %51 {strides = array<i32>} : memref<1x16x64xf32, #tpu.memory_space<vmem>>, vector<1x16x64xf32>,
    return
  }
  func.func @transform_0(%arg0: i32) -> (i32, i32, i32) {
    %c0_i32 = arith.constant 0 : i32
    %c0_i32_0 = arith.constant 0 : i32
    %c0_i32_1 = arith.constant 0 : i32
    return %arg0, %c0_i32, %c0_i32_0 : i32, i32, i32
  }
  func.func @transform_1(%arg0: i32) -> (i32, i32, i32) {
    %c0_i32 = arith.constant 0 : i32
    %c0_i32_0 = arith.constant 0 : i32
    %c0_i32_1 = arith.constant 0 : i32
    %c0_i32_2 = arith.constant 0 : i32
    return %c0_i32, %c0_i32_0, %c0_i32_1 : i32, i32, i32
  }
  func.func @transform_2(%arg0: i32) -> (i32, i32) {
    %c0_i32 = arith.constant 0 : i32
    %c0_i32_0 = arith.constant 0 : i32
    %c0_i32_1 = arith.constant 0 : i32
    return %c0_i32, %c0_i32_0 : i32, i32
  }
  func.func @transform_3(%arg0: i32) -> (i32, i32, i32) {
    %c0_i32 = arith.constant 0 : i32
    %c0_i32_0 = arith.constant 0 : i32
    %c0_i32_1 = arith.constant 0 : i32
    %c0_i32_2 = arith.constant 0 : i32
    return %c0_i32, %c0_i32_0, %c0_i32_1 : i32, i32, i32
  }
  func.func @transform_4(%arg0: i32) -> (i32, i32) {
    %c0_i32 = arith.constant 0 : i32
    %c0_i32_0 = arith.constant 0 : i32
    %c0_i32_1 = arith.constant 0 : i32
    return %c0_i32, %c0_i32_0 : i32, i32
  }
  func.func @transform_5(%arg0: i32) -> (i32, i32, i32) {
    %c0_i32 = arith.constant 0 : i32
    %c0_i32_0 = arith.constant 0 : i32
    %c0_i32_1 = arith.constant 0 : i32
    return %arg0, %c0_i32, %c0_i32_0 : i32, i32, i32
  }
}

</mosaic_0001>

<bundles_post_ra>
// kernel: tile.13
= control target key start
LH: loop header
LB: loop body
LE: loop exit
PB: predicated region body
PF: predicated region fallthrough
CT: control target
= control target key end

     0   :  { %s28_s0 = inlined_call_operand.vmem [shape: f32[4], index: 0, kind: input, shape index: {}]   ;;  %s29_s1 = inlined_call_operand.vmem [shape: f32[16,4], index: 1, kind: output, shape index: {}]  }
   0x1   :  { %v4_v0 = vld [vmem:[%s28_s0] ss:$0 sm:$0xff] }
   0x2   :  { %5 = vst [vmem:[%s29_s1] sm:$0xff] %v4_v0  ;;  %8 = vst [vmem:[%s29_s1 + $0x8] sm:$0xff] %v4_v0 }

// kernel: tile.14
= control target key start
LH: loop header
LB: loop body
LE: loop exit
PB: predicated region body
PF: predicated region fallthrough
CT: control target
= control target key end

     0   :  { %s131_s10 = smov 60   ;;  %s132_s11 = smov 52   ;;  %vm3_vm0 = vcmask 31744   ;;  %vm9_vm1 = vcmask 523744   ;;  %vm15_vm2 = vcmask 490944   ;;  %vm21_vm3 = vcmask 458144   ;;  %s207_s0 = inlined_call_operand.vmem [shape: f32[16,4], index: 0, kind: input, shape index: {}]   ;;  %s208_s1 = inlined_call_operand.vmem [shape: f32[1,64], index: 1, kind: output, shape index: {}]  }
   0x1   :  { %v101_v0 = vld [vmem:[%s207_s0 + $0xf] sm:$0x1]   ;;  %v103_v1 = vld [vmem:[%s207_s0 + $0xd] sm:$0x1]   ;;  %v102_v2 = vld [vmem:[%s207_s0 + $0xe] sm:$0x1]  }
   0x2   :  { %7 = vrot.lane.b32.xlu0 %v101_v0, %s131_s10  ;;  %19 = vrot.lane.b32.xlu1 %v103_v1, %s132_s11  ;;  %v104_v3 = vld [vmem:[%s207_s0 + $0xc] sm:$0x1]   ;;  %s133_s16 = smov 56   ;;  %s134_s17 = smov 48   ;;  %v105_v4 = vld [vmem:[%s207_s0 + $0xb] sm:$0x1]  }
   0x3   :  { %v106_v5 = vld [vmem:[%s207_s0 + $0xa] sm:$0x1]   ;;  %v2_v6 = vld [vmem:[%s207_s0] sm:$0x1]   ;;  %s135_s24 = smov 44   ;;  %s136_s25 = smov 40  }
   0x4   :  { %4 = vst.msk [vmem:[#allocation0] sm:$0x1] %vm3_vm0, %v2_v6   ;;  %v107_v7 = vld [vmem:[%s207_s0 + $0x9] sm:$0x1]   ;;  %v108_v8 = vld [vmem:[%s207_s0 + $0x8] sm:$0x1]  }
   0x5   :  { %s137_s30 = smov 36   ;;  %s138_s2 = smov 32   ;;  %v109_v9 = vld [vmem:[%s207_s0 + $0x7] sm:$0x1]   ;;  %v110_v10 = vld [vmem:[%s207_s0 + $0x6] sm:$0x1]  }
   0x6   :  { %13 = vrot.lane.b32.xlu0 %v102_v2, %s133_s16  ;;  %25 = vrot.lane.b32.xlu1 %v104_v3, %s134_s17  ;;  %s139_s7 = smov 28   ;;  %s140_s8 = smov 24   ;;  %v111_v11 = vld [vmem:[%s207_s0 + $0x5] sm:$0x1]   ;;  %v112_v12 = vld [vmem:[%s207_s0 + $0x4] sm:$0x1]  }
   0x7   :  { %s141_s13 = smov 20   ;;  %s142_s14 = smov 16   ;;  %v113_v13 = vld [vmem:[%s207_s0 + $0x3] sm:$0x1]   ;;  %v114_v14 = vld [vmem:[%s207_s0 + $0x2] sm:$0x1]  }
   0x8   :  { %s143_s19 = smov 12   ;;  %s144_s20 = smov 8   ;;  %v115_v15 = vld [vmem:[%s207_s0 + $0x1] sm:$0x1]   ;;  %vm27_vm4 = vcmask 425344   ;;  %vm33_vm5 = vcmask 392544  }
   0x9   :  { %s145_s0 = smov 4   ;;  %vm39_vm6 = vcmask 359744   ;;  %vm45_vm7 = vcmask 326944   ;;  %vm51_vm8 = vcmask 294144   ;;  %vm57_vm9 = vcmask 261344  }
   0xa   :  { %31 = vrot.lane.b32.xlu0 %v105_v4, %s135_s24  ;;  %37 = vrot.lane.b32.xlu1 %v106_v5, %s136_s25  ;;  %vm63_vm10 = vcmask 228544   ;;  %vm69_vm11 = vcmask 195744   ;;  %vm75_vm12 = vcmask 162944   ;;  %vm81_vm13 = vcmask 130144  }
   0xb   :  { %vm87_vm14 = vcmask 97344   ;;  %vm93_vm15 = vcmask 64544  }
   0xe   :  { %43 = vrot.lane.b32.xlu0 %v107_v7, %s137_s30  ;;  %49 = vrot.lane.b32.xlu1 %v108_v8, %s138_s2 }
  0x12   :  { %55 = vrot.lane.b32.xlu0 %v109_v9, %s139_s7  ;;  %61 = vrot.lane.b32.xlu1 %v110_v10, %s140_s8 }
  0x16   :  { %67 = vrot.lane.b32.xlu0 %v111_v11, %s141_s13  ;;  %73 = vrot.lane.b32.xlu1 %v112_v12, %s142_s14 }
  0x1a   :  { %79 = vrot.lane.b32.xlu0 %v113_v13, %s143_s19  ;;  %85 = vrot.lane.b32.xlu1 %v114_v14, %s144_s20 }
  0x1e   :  { %91 = vrot.lane.b32.xlu0 %v115_v15, %s145_s0 }
  0x74   :  { %v8_v16 = vpop.permute.xlu0 %7   ;;  %v20_v17 = vpop.permute.xlu1 %19  }
  0x75   :  { %10 = vst.msk [vmem:[#allocation0] sm:$0x1] %vm9_vm1, %v8_v16  }
  0x78   :  { %v14_v18 = vpop.permute.xlu0 %13   ;;  %v26_v19 = vpop.permute.xlu1 %25  }
  0x79   :  { %16 = vst.msk [vmem:[#allocation0] sm:$0x1] %vm15_vm2, %v14_v18  }
  0x7a   :  { %22 = vst.msk [vmem:[#allocation0] sm:$0x1] %vm21_vm3, %v20_v17  }
  0x7b   :  { %28 = vst.msk [vmem:[#allocation0] sm:$0x1] %vm27_vm4, %v26_v19  }
  0x7c   :  { %v32_v20 = vpop.permute.xlu0 %31   ;;  %v38_v21 = vpop.permute.xlu1 %37  }
  0x7d   :  { %34 = vst.msk [vmem:[#allocation0] sm:$0x1] %vm33_vm5, %v32_v20  }
  0x7e   :  { %40 = vst.msk [vmem:[#allocation0] sm:$0x1] %vm39_vm6, %v38_v21  }
  0x80   :  { %v44_v22 = vpop.permute.xlu0 %43   ;;  %v50_v23 = vpop.permute.xlu1 %49  }
  0x81   :  { %46 = vst.msk [vmem:[#allocation0] sm:$0x1] %vm45_vm7, %v44_v22  }
  0x82   :  { %52 = vst.msk [vmem:[#allocation0] sm:$0x1] %vm51_vm8, %v50_v23  }
  0x84   :  { %v56_v24 = vpop.permute.xlu0 %55   ;;  %v62_v25 = vpop.permute.xlu1 %61  }
  0x85   :  { %58 = vst.msk [vmem:[#allocation0] sm:$0x1] %vm57_vm9, %v56_v24  }
  0x86   :  { %64 = vst.msk [vmem:[#allocation0] sm:$0x1] %vm63_vm10, %v62_v25  }
  0x88   :  { %v68_v26 = vpop.permute.xlu0 %67   ;;  %v74_v27 = vpop.permute.xlu1 %73  }
  0x89   :  { %70 = vst.msk [vmem:[#allocation0] sm:$0x1] %vm69_vm11, %v68_v26  }
  0x8a   :  { %76 = vst.msk [vmem:[#allocation0] sm:$0x1] %vm75_vm12, %v74_v27  }
  0x8c   :  { %v80_v28 = vpop.permute.xlu0 %79   ;;  %v86_v29 = vpop.permute.xlu1 %85  }
  0x8d   :  { %82 = vst.msk [vmem:[#allocation0] sm:$0x1] %vm81_vm13, %v80_v28  }
  0x8e   :  { %88 = vst.msk [vmem:[#allocation0] sm:$0x1] %vm87_vm14, %v86_v29  }
  0x90   :  { %v92_v30 = vpop.permute.xlu0 %91  }
  0x91   :  { %94 = vst.msk [vmem:[#allocation0] sm:$0x1] %vm93_vm15, %v92_v30  }
  0x98   :  { %v98_v31 = vld [vmem:[#allocation0] sm:$0x1] }
  0x99   :  { %100 = vst [vmem:[%s208_s1] sm:$0x1] %v98_v31 }

// kernel: basic_block_forward.1
= control target key start
LH: loop header
LB: loop body
LE: loop exit
PB: predicated region body
PF: predicated region fallthrough
CT: control target
= control target key end

     0   :  { %s1285_s18 = smov 0   ;;  %s1505_s0 = inlined_call_operand.vmem [shape: f32[2,16,64], index: 0, kind: input, shape index: {}]   ;;  %s1506_s1 = inlined_call_operand.vmem [shape: f32[3,72,64], index: 1, kind: input, shape index: {}]   ;;  %s1507_s2 = inlined_call_operand.vmem [shape: f32[1,64], index: 2, kind: input, shape index: {}]   ;;  %s1508_s3 = inlined_call_operand.vmem [shape: f32[3,72,64], index: 3, kind: input, shape index: {}]   ;;  %s1509_s4 = inlined_call_operand.vmem [shape: f32[1,64], index: 4, kind: input, shape index: {}]   ;;  %s1510_s5 = inlined_call_operand.vmem [shape: f32[2,16,64], index: 5, kind: output, shape index: {}]  }
   0x1 LB: > { %s878_s19 = sadd.s32 4294967295, %s1252_s18   ;;  %p882_p0 = scmp.ge.s32.totalorder %s1252_s18, 1  ;;  %s1252_s18 = sphi %s1285_s18, %s15_s18  }
   0x2   : > { %p187_p1 = scmp.lt.s32.totalorder %s1252_s18, 3 }
   0x4   : > { %p188_p2 = pnand %p882_p0, %p187_p1 }
   0x5   : > { %v887_v0 = vld [vmem:[%s1506_s1 + $0x48] sm:$0xff] (!%p188_p2)  ;;  %v888_v1 = vld [vmem:[%s1506_s1 + $0x50] sm:$0xff] (!%p188_p2)  ;;  %v889_v2 = vld [vmem:[%s1506_s1 + $0x58] sm:$0xff] (!%p188_p2)  ;;  %p215_p3 = scmp.lt.s32.totalorder (!%p188_p2), %s878_s19, 1  ;;  %vm225_vm0 = vcmask (!%p188_p2), 588800   ;;  %v1254_v5 = vmov (!%p188_p2), 0.0  }
   0x6   : > { %191 = sbr.rel (%p188_p2) target bundleno = 544 (0x220), region = 40  ;;  %v1133_v3 = vpack.c.bf16 (!%p188_p2), %v888_v1, %v887_v0  ;;  %v890_v4 = vld [vmem:[%s1506_s1 + $0x60] sm:$0xff] (!%p188_p2)  ;;  %226 = vst.msk [vmem:[#allocation2] sm:$0xff] (!%p188_p2), %vm225_vm0, %v1254_v5  ;;  %227 = vst.msk [vmem:[#allocation2 + $0x8] sm:$0xff] (!%p188_p2), %vm225_vm0, %v1254_v5  ;;  %vm228_vm1 = vcmask (!%p188_p2), 582656   ;;  %v891_v7 = vld [vmem:[%s1506_s1 + $0x68] sm:$0xff] (!%p188_p2) }
   0x7   : > { %v1137_v6 = vpack.c.bf16 (!%p188_p2), %v890_v4, %v889_v2  ;;  %v892_v8 = vld [vmem:[%s1506_s1 + $0x70] sm:$0xff] (!%p188_p2)  ;;  %229 = vst.msk [vmem:[#allocation2 + $0x10] sm:$0x3] (!%p188_p2), %vm228_vm1, %v1254_v5  ;;  %vm232_vm2 = vcmask (!%p188_p2), 523264   ;;  %v893_v10 = vld [vmem:[%s1506_s1 + $0x78] sm:$0xff] (!%p188_p2)  ;;  %v894_v11 = vld [vmem:[%s1506_s1 + $0x80] sm:$0xff] (!%p188_p2) }
   0x8   : > { %1134 = vmatprep.subr.bf16.mxu0 (!%p188_p2), %v1133_v3  ;;  %v1141_v9 = vpack.c.bf16 (!%p188_p2), %v892_v8, %v891_v7  ;;  %v1145_v14 = vpack.c.bf16 (!%p188_p2), %v894_v11, %v893_v10  ;;  %v912_v15 = vld [vmem:[%s1508_s3 + $0x48] sm:$0xff] (!%p188_p2)  ;;  %v913_v16 = vld [vmem:[%s1508_s3 + $0x50] sm:$0xff] (!%p188_p2)  ;;  %v237_v20 = vld [vmem:[%s1506_s1] sm:$0xff] (!%p188_p2) }
   0x9   : > { %1136 = vmatpush3.bf16.msra.mxu0 (!%p188_p2), %v1133_v3  ;;  %v1181_v17 = vpack.c.bf16 (!%p188_p2), %v913_v16, %v912_v15  ;;  %v895_v18 = vld [vmem:[%s1506_s1 + $0x88] sm:$0xff] (!%p188_p2)  ;;  %v239_v22 = vld [vmem:[%s1506_s1 + $0x10] sm:$0xff] (!%p188_p2)  ;;  %v240_v23 = vld [vmem:[%s1506_s1 + $0x18] sm:$0xff] (!%p188_p2) }
   0xa   : > { %1138 = vmatprep.subr.bf16.mxu0 (!%p188_p2), %v1137_v6  ;;  %v238_v21 = vld [vmem:[%s1506_s1 + $0x8] sm:$0xff] (!%p188_p2)  ;;  %v1153_v26 = vpack.c.bf16 (!%p188_p2), %v240_v23, %v239_v22  ;;  %v241_v28 = vld [vmem:[%s1506_s1 + $0x20] sm:$0xff] (!%p188_p2)  ;;  %v243_v31 = vld [vmem:[%s1506_s1 + $0x30] sm:$0xff] (!%p188_p2) }
   0xb   : > { %1182 = vmatprep.subr.bf16.mxu1 (!%p188_p2), %v1181_v17  ;;  %v1149_v24 = vpack.c.bf16 (!%p188_p2), %v238_v21, %v237_v20  ;;  %v242_v29 = vld [vmem:[%s1506_s1 + $0x28] sm:$0xff] (!%p188_p2)  ;;  %v244_v32 = vld [vmem:[%s1506_s1 + $0x38] sm:$0xff] (!%p188_p2)  ;;  %v245_v34 = vld [vmem:[%s1506_s1 + $0x40] sm:$0xff] (!%p188_p2) }
   0xc   : > { %1184 = vmatpush3.bf16.msra.mxu1 (!%p188_p2), %v1181_v17  ;;  %v1157_v30 = vpack.c.bf16 (!%p188_p2), %v242_v29, %v241_v28  ;;  %v1161_v33 = vpack.c.bf16 (!%p188_p2), %v244_v32, %v243_v31  ;;  %v900_v35 = vld [vmem:[%s1506_s1 + $0x90] sm:$0xff] (!%p188_p2)  ;;  %v901_v36 = vld [vmem:[%s1506_s1 + $0x98] sm:$0xff] (!%p188_p2)  ;;  %v902_v37 = vld [vmem:[%s1506_s1 + $0xa0] sm:$0xff] (!%p188_p2) }
   0xd   : > { %s1512_s19 = smov (!%p215_p3, %s878_s19), 1  ;;  %1140 = vmatpush3.bf16.msra.mxu0 %v1137_v6  ;;  %v903_v38 = vld [vmem:[%s1506_s1 + $0xa8] sm:$0xff]  ;;  %v1165_v39 = vpack.c.bf16 %v901_v36, %v900_v35  ;;  %v904_v43 = vld [vmem:[%s1506_s1 + $0xb0] sm:$0xff]  ;;  %v905_v44 = vld [vmem:[%s1506_s1 + $0xb8] sm:$0xff] }
   0xe   : > { %s939_s7 = sshll.u32 %s1512_s19, 4  ;;  %1142 = vmatprep.subr.bf16.mxu0 %v1141_v9  ;;  %v1169_v41 = vpack.c.bf16 %v903_v38, %v902_v37  ;;  %v1173_v45 = vpack.c.bf16 %v905_v44, %v904_v43  ;;  %v906_v46 = vld [vmem:[%s1506_s1 + $0xc0] sm:$0xff]  ;;  %v907_v47 = vld [vmem:[%s1506_s1 + $0xc8] sm:$0xff]  ;;  %v908_v49 = vld [vmem:[%s1506_s1 + $0xd0] sm:$0xff] }
   0xf   : > { %s219_s12 = scalar_lea.vmem %s1505_s0, %s939_s7  ;;  %v1177_v48 = vpack.c.bf16 %v907_v47, %v906_v46  ;;  %v914_v51 = vld [vmem:[%s1508_s3 + $0x58] sm:$0xff]  ;;  %v915_v52 = vld [vmem:[%s1508_s3 + $0x60] sm:$0xff]  ;;  %v916_v54 = vld [vmem:[%s1508_s3 + $0x68] sm:$0xff]  ;;  %s224_s27 = scalar_lea.vmem %s1510_s5, %s939_s7 }
  0x10   : > { %v1327_v12 = vld [vmem:[%s219_s12] sm:$0xff]  ;;  %v1329_v13 = vld [vmem:[%s219_s12 + $0x8] sm:$0xff]  ;;  %v1185_v53 = vpack.c.bf16 %v915_v52, %v914_v51  ;;  %v917_v55 = vld [vmem:[%s1508_s3 + $0x70] sm:$0xff] }
  0x11   : > { %233 = vst.msk [vmem:[#allocation2 + $0x1] sm:$0xff] %vm232_vm2, %v1327_v12  ;;  %234 = vst.msk [vmem:[#allocation2 + $0x9] sm:$0xff] %vm232_vm2, %v1329_v13  ;;  %1144 = vmatpush3.bf16.msra.mxu0 %v1141_v9  ;;  %v1189_v56 = vpack.c.bf16 %v917_v55, %v916_v54  ;;  %v918_v57 = vld [vmem:[%s1508_s3 + $0x78] sm:$0xff]  ;;  %v919_v58 = vld [vmem:[%s1508_s3 + $0x80] sm:$0xff] }
  0x12   : > { %1146 = vmatprep.subr.bf16.mxu0 %v1145_v14  ;;  %1186 = vmatprep.subr.bf16.mxu1 %v1185_v53  ;;  %v1193_v59 = vpack.c.bf16 %v919_v58, %v918_v57  ;;  %v920_v60 = vld [vmem:[%s1508_s3 + $0x88] sm:$0xff]  ;;  %v530_v61 = vld [vmem:[%s1508_s3] sm:$0xff]  ;;  %v532_v7 = vld [vmem:[%s1508_s3 + $0x10] sm:$0xff] }
  0x13   : > { %1188 = vmatpush3.bf16.msra.mxu1 %v1185_v53  ;;  %v531_v62 = vld [vmem:[%s1508_s3 + $0x8] sm:$0xff]  ;;  %v911_v0 = vld [vmem:[%s1507_s2] ss:$0 sm:$0xff]  ;;  %v533_v8 = vld [vmem:[%s1508_s3 + $0x18] sm:$0xff] }
  0x14   : > { %1190 = vmatprep.subr.bf16.mxu1 %v1189_v56  ;;  %v1197_v63 = vpack.c.bf16 %v531_v62, %v530_v61  ;;  %v1201_v10 = vpack.c.bf16 %v533_v8, %v532_v7  ;;  %v535_v15 = vld [vmem:[%s1508_s3 + $0x28] sm:$0xff]  ;;  %v538_v21 = vld [vmem:[%s1508_s3 + $0x40] sm:$0xff]  ;;  %v925_v22 = vld [vmem:[%s1508_s3 + $0x90] sm:$0xff] }
  0x15   : > { %1148 = vmatpush3.bf16.msra.mxu0 %v1145_v14  ;;  %v534_v14 = vld [vmem:[%s1508_s3 + $0x20] sm:$0xff]  ;;  %v926_v23 = vld [vmem:[%s1508_s3 + $0x98] sm:$0xff]  ;;  %v929_v29 = vld [vmem:[%s1508_s3 + $0xb0] sm:$0xff] }
  0x16   : > { %1023 = vmatprep.subr.mxu0 %v895_v18  ;;  %v1205_v17 = vpack.c.bf16 %v535_v15, %v534_v14  ;;  %v933_v36 = vld [vmem:[%s1508_s3 + $0xd0] sm:$0xff]  ;;  %v936_v38 = vld [vmem:[%s1509_s4] ss:$0 sm:$0xff] }
  0x17   : > { %1192 = vmatpush3.bf16.msra.mxu1 %v1189_v56 }
  0x18   : > { %v246_v19 = vld [vmem:[#allocation2 + $0x1] sm:$0xff]  ;;  %v247_v25 = vld [vmem:[#allocation2 + $0x9] sm:$0xff]  ;;  %1194 = vmatprep.subr.bf16.mxu1 %v1193_v59 }
  0x19   : > { %1025 = vmatprep.mubr.msk.f32.mxu0 %vm225_vm0, %v246_v19  ;;  %v235_v27 = vld [vmem:[#allocation2] sm:$0xff]  ;;  %1024 = vmatpush3.msra.mxu0 %v895_v18  ;;  %v236_v40 = vld [vmem:[#allocation2 + $0x8] sm:$0xff]  ;;  %v536_v18 = vld [vmem:[%s1508_s3 + $0x30] sm:$0xff] }
  0x1a   : > { %1150 = vmatprep.subr.bf16.mxu0 %v1149_v24  ;;  %1026 = vmatmul.mubr.msk.f32.vlgmr.msra.gmra.mrb[0].mxu0 %vm225_vm0, %v247_v25  ;;  %v420_v42 = vld [vmem:[#allocation2 + $0x2] sm:$0xff]  ;;  %v421_v50 = vld [vmem:[#allocation2 + $0xa] sm:$0xff]  ;;  %v537_v19 = vld [vmem:[%s1508_s3 + $0x38] sm:$0xff] }
  0x1b   : > { %1152 = vmatpush3.bf16.msra.mxu0 %v1149_v24  ;;  %1046 = vmatprep.mubr.msk.f32.mxu0 %vm225_vm0, %v235_v27  ;;  %v1209_v20 = vpack.c.bf16 %v537_v19, %v536_v18  ;;  %v927_v24 = vld [vmem:[%s1508_s3 + $0xa0] sm:$0xff]  ;;  %v928_v25 = vld [vmem:[%s1508_s3 + $0xa8] sm:$0xff] }
  0x1c   : > { %1154 = vmatprep.subr.bf16.mxu0 %v1153_v26  ;;  %1196 = vmatpush3.bf16.msra.mxu1 %v1193_v59  ;;  %v1217_v27 = vpack.c.bf16 %v928_v25, %v927_v24 }
  0x1d   : > { %1086 = vmatprep.subr.mxu1 %v920_v60 }
  0x1f   : > { %1156 = vmatpush3.bf16.msra.mxu0 %v1153_v26  ;;  %v1213_v26 = vpack.c.bf16 %v926_v23, %v925_v22 }
  0x20   : > { %1158 = vmatprep.subr.bf16.mxu0 %v1157_v30  ;;  %1087 = vmatpush3.msra.mxu1 %v920_v60 }
  0x21   : > { %1198 = vmatprep.subr.bf16.mxu1 %v1197_v63 }
  0x23   : > { %1160 = vmatpush3.bf16.msra.mxu0 %v1157_v30  ;;  %v930_v30 = vld [vmem:[%s1508_s3 + $0xb8] sm:$0xff] }
  0x24   : > { %1162 = vmatprep.subr.bf16.mxu0 %v1161_v33  ;;  %v1221_v32 = vpack.c.bf16 %v930_v30, %v929_v29 }
  0x27   : > { %1164 = vmatpush3.bf16.msra.mxu0 %v1161_v33  ;;  %v931_v33 = vld [vmem:[%s1508_s3 + $0xc0] sm:$0xff] }
  0x28   : > { %1044 = vmatprep.subr.mxu0 %v245_v34 }
  0x2b   : > { %1045 = vmatpush3.msra.mxu0 %v245_v34  ;;  %v932_v34 = vld [vmem:[%s1508_s3 + $0xc8] sm:$0xff] }
  0x2c   : > { %1166 = vmatprep.subr.bf16.mxu0 %v1165_v39  ;;  %1047 = vmatmul.mubr.msk.f32.vlgmr.msra.gmra.mrb[0].mxu0 %vm225_vm0, %v236_v40  ;;  %v1225_v35 = vpack.c.bf16 %v932_v34, %v931_v33 }
  0x2d   : > { %1168 = vmatpush3.bf16.msra.mxu0 %v1165_v39  ;;  %1067 = vmatprep.mubr.msk.f32.mxu0 %vm225_vm0, %v420_v42 }
  0x2e   : > { %1170 = vmatprep.subr.bf16.mxu0 %v1169_v41 }
  0x31   : > { %1172 = vmatpush3.bf16.msra.mxu0 %v1169_v41 }
  0x32   : > { %1174 = vmatprep.subr.bf16.mxu0 %v1173_v45 }
  0x35   : > { %1176 = vmatpush3.bf16.msra.mxu0 %v1173_v45 }
  0x36   : > { %1178 = vmatprep.subr.bf16.mxu0 %v1177_v48 }
  0x39   : > { %1180 = vmatpush3.bf16.msra.mxu0 %v1177_v48 }
  0x3a   : > { %1065 = vmatprep.subr.mxu0 %v908_v49 }
  0x3d   : > { %1066 = vmatpush3.msra.mxu0 %v908_v49 }
  0x3e   : > { %1068 = vmatmul.mubr.msk.f32.vlgmr.msra.gmra.mrb[0].mxu0 %vm225_vm0, %v421_v50 }
 0x111   : > { %v1069_v1 = vpop.f32.mrb[0].mxu0 }
 0x112   : > { %v523_v2 = vadd.f32 %v1069_v1, %v911_v0  ;;  %v504_v3 = vpop.f32.mrb[1].mxu0 }
 0x113   : > { %v522_v4 = vadd.f32 %v911_v0, %v504_v3 }
 0x114   : > { %v525_v5 = vmax.f32 %v523_v2, 0.0 }
 0x115   : > { %v524_v6 = vmax.f32 %v522_v4, 0.0 }
 0x116   : > { %527 = vst.msk [vmem:[#allocation2 + $0x9] sm:$0xff] %vm232_vm2, %v525_v5 }
 0x117   : > { %526 = vst.msk [vmem:[#allocation2 + $0x1] sm:$0xff] %vm232_vm2, %v524_v6 }
 0x11d   : > { %v540_v11 = vld [vmem:[#allocation2 + $0x9] sm:$0xff] }
 0x11e   : > { %v539_v9 = vld [vmem:[#allocation2 + $0x1] sm:$0xff]  ;;  %v714_v37 = vld [vmem:[#allocation2 + $0xa] sm:$0xff] }
 0x11f   : > { %1088 = vmatprep.mubr.msk.f32.mxu1 %vm225_vm0, %v539_v9  ;;  %v528_v16 = vld [vmem:[#allocation2] sm:$0xff]  ;;  %v529_v28 = vld [vmem:[#allocation2 + $0x8] sm:$0xff] }
 0x120   : > { %1089 = vmatmul.mubr.msk.f32.vlgmr.msra.gmra.mrb[0].mxu1 %vm225_vm0, %v540_v11  ;;  %v713_v31 = vld [vmem:[#allocation2 + $0x2] sm:$0xff] }
 0x121   : > { %1200 = vmatpush3.bf16.msra.mxu1 %v1197_v63  ;;  %1109 = vmatprep.mubr.msk.f32.mxu1 %vm225_vm0, %v528_v16 }
 0x122   : > { %1202 = vmatprep.subr.bf16.mxu1 %v1201_v10 }
 0x125   : > { %1204 = vmatpush3.bf16.msra.mxu1 %v1201_v10 }
 0x126   : > { %1206 = vmatprep.subr.bf16.mxu1 %v1205_v17 }
 0x129   : > { %1208 = vmatpush3.bf16.msra.mxu1 %v1205_v17 }
 0x12a   : > { %1210 = vmatprep.subr.bf16.mxu1 %v1209_v20 }
 0x12d   : > { %1212 = vmatpush3.bf16.msra.mxu1 %v1209_v20 }
 0x12e   : > { %1107 = vmatprep.subr.mxu1 %v538_v21 }
 0x131   : > { %1108 = vmatpush3.msra.mxu1 %v538_v21 }
 0x132   : > { %1110 = vmatmul.mubr.msk.f32.vlgmr.msra.gmra.mrb[0].mxu1 %vm225_vm0, %v529_v28  ;;  %1214 = vmatprep.subr.bf16.mxu1 %v1213_v26 }
 0x133   : > { %1216 = vmatpush3.bf16.msra.mxu1 %v1213_v26  ;;  %1130 = vmatprep.mubr.msk.f32.mxu1 %vm225_vm0, %v713_v31 }
 0x134   : > { %1218 = vmatprep.subr.bf16.mxu1 %v1217_v27 }
 0x137   : > { %1220 = vmatpush3.bf16.msra.mxu1 %v1217_v27 }
 0x138   : > { %1222 = vmatprep.subr.bf16.mxu1 %v1221_v32 }
 0x13b   : > { %1224 = vmatpush3.bf16.msra.mxu1 %v1221_v32 }
 0x13c   : > { %1226 = vmatprep.subr.bf16.mxu1 %v1225_v35 }
 0x13f   : > { %1228 = vmatpush3.bf16.msra.mxu1 %v1225_v35 }
 0x140   : > { %1128 = vmatprep.subr.mxu1 %v933_v36 }
 0x143   : > { %1129 = vmatpush3.msra.mxu1 %v933_v36 }
 0x144   : > { %1131 = vmatmul.mubr.msk.f32.vlgmr.msra.gmra.mrb[0].mxu1 %vm225_vm0, %v714_v37 }
 0x217   : > { %v1132_v39 = vpop.f32.mrb[0].mxu1 }
 0x218   : > { %v816_v40 = vadd.f32 %v1132_v39, %v936_v38  ;;  %v797_v41 = vpop.f32.mrb[1].mxu1 }
 0x219   : > { %v815_v42 = vadd.f32 %v936_v38, %v797_v41 }
 0x21a   : > { %v818_v43 = vadd.f32 %v816_v40, %v1329_v13 }
 0x21b   : > { %v817_v44 = vadd.f32 %v815_v42, %v1327_v12 }
 0x21c   : > { %v820_v45 = vmax.f32 %v818_v43, 0.0 }
 0x21d   : > { %v819_v46 = vmax.f32 %v817_v44, 0.0 }
 0x21e   : > { %822 = vst.msk [vmem:[%s224_s27 + $0x8] sm:$0xff] %vm232_vm2, %v820_v45 }
 0x21f   : > { %821 = vst.msk [vmem:[%s224_s27] sm:$0xff] %vm232_vm2, %v819_v46 }
 0x220 PF: > { %s15_s18 = sadd.s32 1, %s1252_s18  }
 0x221   : > { %p12_p4 = scmp.ge.s32.totalorder %s15_s18, 4  }
 0x223   :  { %14 = sbr.rel (!%p12_p4) target bundleno = 1 (0x1), region = 74 }

</bundles_post_ra>
